<compile_context>
chip_gen: v7x
topology: tpu7x:2x2x1
jax: 0.10.0
libtpu: 0.0.40
codegen_flags: <defaults>
</compile_context>

<pallas_src>
import jax
import jax.numpy as jnp
from jax.experimental import pallas as pl
from jax.experimental.pallas import tpu as pltpu

_EPS = 1e-6
_MAX_ROW_TILE = 2048   # rows per grid step
_N_OUTER = 2           # parallel outer blocks (covers v7x's 2 TensorCores)


def _mask_iou_loss_kernel(x_ref, t_ref, acc_ref):
    """One (row_tile, 36) tile -> per-row losses accumulated into acc_ref (row_tile, 1)."""
    @pl.when(pl.program_id(1) == 0)
    def _():
        acc_ref[...] = jnp.zeros_like(acc_ref)

    x = x_ref[...]   # (row_tile, 36) f32
    t = t_ref[...]   # (row_tile, 36) f32

    l_max = jnp.maximum(x, t)
    l_min = jnp.minimum(x, t)
    # Where l_min < 0: l_max -= l_min, l_min = 0.  Branch-free equivalent:
    l_max = l_max - jnp.minimum(l_min, 0.0)
    l_min = jnp.maximum(l_min, 0.0)

    max_sum_l2 = jnp.sum(l_max * l_max, axis=-1, keepdims=True) + _EPS  # (row_tile, 1)
    min_sum_l2 = jnp.sum(l_min * l_min, axis=-1, keepdims=True) + _EPS  # (row_tile, 1)

    acc_ref[...] += jnp.log(max_sum_l2 / min_sum_l2)


def _round_up(a, b):
    return pl.cdiv(a, b) * b


def mask_iou_loss(inputs, target):
    """inputs, target: (B, N, 36) -> scalar loss (float32)."""
    assert inputs.shape == target.shape
    assert inputs.shape[-1] == 36

    x = inputs.reshape(-1, 36).astype(jnp.float32)
    t = target.reshape(-1, 36).astype(jnp.float32)
    m = x.shape[0]

    # Pick a large, sublane-aligned row tile; factor the row-block count into
    # (outer parallel) x (inner arbitrary/reduction) grid axes.
    row_tile = min(_MAX_ROW_TILE, _round_up(m, 8))
    n_blocks = pl.cdiv(m, row_tile)
    n_outer = min(_N_OUTER, n_blocks)
    n_inner = pl.cdiv(n_blocks, n_outer)
    m_pad = n_outer * n_inner * row_tile

    if m_pad != m:
        pad = ((0, m_pad - m), (0, 0))
        x = jnp.pad(x, pad)   # zero rows -> loss log(eps/eps) = 0
        t = jnp.pad(t, pad)

    in_map = lambda o, i: (o * n_inner + i, 0)

    partial = pl.pallas_call(
        _mask_iou_loss_kernel,
        out_shape=jax.ShapeDtypeStruct((n_outer * row_tile, 1), jnp.float32),
        grid_spec=pltpu.PrefetchScalarGridSpec(
            num_scalar_prefetch=0,
            grid=(n_outer, n_inner),
            in_specs=[
                pl.BlockSpec((row_tile, 36), in_map),
                pl.BlockSpec((row_tile, 36), in_map),
            ],
            # One resident (row_tile, 1) partial-sum block per outer grid index;
            # it acts as the accumulator across the inner reduction axis.
            out_specs=pl.BlockSpec((row_tile, 1), lambda o, i: (o, 0)),
        ),
        compiler_params=pltpu.CompilerParams(
            dimension_semantics=("parallel", "arbitrary"),
        ),
    )(x, t)

    # Tiny final reduction + mean over the real (un-padded) row count.
    return jnp.sum(partial) / jnp.float32(m)


def _mask_iou_loss_ref(inputs, target):
    x = inputs.reshape(-1, 36).astype(jnp.float32)
    t = target.reshape(-1, 36).astype(jnp.float32)
    l_max = jnp.maximum(x, t)
    l_min = jnp.minimum(x, t)
    neg = l_min < 0.0
    l_max = jnp.where(neg, l_max - l_min, l_max)
    l_min = jnp.where(neg, 0.0, l_min)
    max_sum_l2 = jnp.sum(l_max**2, axis=-1) + _EPS
    min_sum_l2 = jnp.sum(l_min**2, axis=-1) + _EPS
    return jnp.mean(jnp.log(max_sum_l2 / min_sum_l2))


if __name__ == "__main__":
    key = jax.random.PRNGKey(0)
    k1, k2 = jax.random.split(key)

    B, N = 2, 8  # small shapes; last dim fixed at 36 by the module semantics
    inputs = jax.random.normal(k1, (B, N, 36), dtype=jnp.float32)
    target = jax.random.normal(k2, (B, N, 36), dtype=jnp.float32)

    loss = mask_iou_loss(inputs, target)
    jax.block_until_ready(loss)

    ref = _mask_iou_loss_ref(inputs, target)
    assert jnp.allclose(loss, ref, rtol=1e-5, atol=1e-5), (loss, ref)

    print("KERNEL_OK")
</pallas_src>

<mosaic_0001>
module attributes {stable_mosaic.version = 11 : i64} {
  func.func @_mask_iou_loss_kernel(%arg0: i32, %arg1: i32, %arg2: memref<16x36xf32, #tpu.memory_space<vmem>>, %arg3: memref<16x36xf32, #tpu.memory_space<vmem>>, %arg4: memref<16x1xf32, #tpu.memory_space<vmem>>) attributes {dimension_semantics = [#tpu.dimension_semantics<parallel>, #tpu.dimension_semantics<arbitrary>], iteration_bounds = array<i64: 1, 1>, scalar_prefetch = 0 : i64, scratch_operands = 0 : i64, tpu.core_type = #tpu.core_type<tc>, window_params = [{transform_indices = @transform_0, window_bounds = array<i64: 16, 36>}, {transform_indices = @transform_1, window_bounds = array<i64: 16, 36>}, {transform_indices = @transform_2, window_bounds = array<i64: 16, 1>}]} {
    %c0_i32 = arith.constant 0 : i32
    %0 = arith.cmpi eq, %arg1, %c0_i32 : i32
    %1 = arith.extui %0 : i1 to i32
    %c0_i32_0 = arith.constant 0 : i32
    %2 = arith.cmpi ne, %1, %c0_i32_0 : i32
    scf.if %2 {
      %cst_13 = arith.constant 0.000000e+00 : f32
      %27 = vector.broadcast %cst_13 : f32 to vector<16x1xf32>
      %c0_14 = arith.constant 0 : index
      %c0_15 = arith.constant 0 : index
      %28 = vector.load %arg4[%c0_14, %c0_15] : memref<16x1xf32, #tpu.memory_space<vmem>>, vector<16x1xf32>
      tpu.vector_store %arg4[%c0_14, %c0_15], %27 {strides = array<i32>} : memref<16x1xf32, #tpu.memory_space<vmem>>, vector<16x1xf32>,
    } else {
    }
    %c0 = arith.constant 0 : index
    %c0_1 = arith.constant 0 : index
    %3 = vector.load %arg2[%c0, %c0_1] : memref<16x36xf32, #tpu.memory_space<vmem>>, vector<16x36xf32>
    %c0_2 = arith.constant 0 : index
    %c0_3 = arith.constant 0 : index
    %4 = vector.load %arg3[%c0_2, %c0_3] : memref<16x36xf32, #tpu.memory_space<vmem>>, vector<16x36xf32>
    %5 = arith.maximumf %3, %4 : vector<16x36xf32>
    %6 = arith.minimumf %3, %4 : vector<16x36xf32>
    %cst = arith.constant 0.000000e+00 : f32
    %7 = vector.broadcast %cst : f32 to vector<16x36xf32>
    %8 = arith.minimumf %6, %7 : vector<16x36xf32>
    %9 = arith.subf %5, %8 : vector<16x36xf32>
    %cst_4 = arith.constant 0.000000e+00 : f32
    %10 = vector.broadcast %cst_4 : f32 to vector<16x36xf32>
    %11 = arith.maximumf %6, %10 : vector<16x36xf32>
    %12 = arith.mulf %9, %9 : vector<16x36xf32>
    %cst_5 = arith.constant dense<0.000000e+00> : vector<16xf32>
    %13 = vector.multi_reduction <add>, %12, %cst_5 [1] : vector<16x36xf32> to vector<16xf32>
    %14 = vector.shape_cast %13 : vector<16xf32> to vector<16x1xf32>
    %cst_6 = arith.constant 9.99999997E-7 : f32
    %15 = vector.broadcast %cst_6 : f32 to vector<16x1xf32>
    %16 = arith.addf %14, %15 : vector<16x1xf32>
    %17 = arith.mulf %11, %11 : vector<16x36xf32>
    %cst_7 = arith.constant dense<0.000000e+00> : vector<16xf32>
    %18 = vector.multi_reduction <add>, %17, %cst_7 [1] : vector<16x36xf32> to vector<16xf32>
    %19 = vector.shape_cast %18 : vector<16xf32> to vector<16x1xf32>
    %cst_8 = arith.constant 9.99999997E-7 : f32
    %20 = vector.broadcast %cst_8 : f32 to vector<16x1xf32>
    %21 = arith.addf %19, %20 : vector<16x1xf32>
    %c0_9 = arith.constant 0 : index
    %c0_10 = arith.constant 0 : index
    %22 = vector.load %arg4[%c0_9, %c0_10] : memref<16x1xf32, #tpu.memory_space<vmem>>, vector<16x1xf32>
    %23 = arith.divf %16, %21 : vector<16x1xf32>
    %24 = math.log %23 : vector<16x1xf32>
    %25 = arith.addf %22, %24 : vector<16x1xf32>
    %c0_11 = arith.constant 0 : index
    %c0_12 = arith.constant 0 : index
    %26 = vector.load %arg4[%c0_11, %c0_12] : memref<16x1xf32, #tpu.memory_space<vmem>>, vector<16x1xf32>
    tpu.vector_store %arg4[%c0_11, %c0_12], %25 {strides = array<i32>} : memref<16x1xf32, #tpu.memory_space<vmem>>, vector<16x1xf32>,
    return
  }
  func.func @transform_0(%arg0: i32, %arg1: i32) -> (i32, i32) {
    %c1_i32 = arith.constant 1 : i32
    %0 = arith.muli %arg0, %c1_i32 : i32
    %1 = arith.addi %0, %arg1 : i32
    %c0_i32 = arith.constant 0 : i32
    %c0_i32_0 = arith.constant 0 : i32
    return %1, %c0_i32 : i32, i32
  }
  func.func @transform_1(%arg0: i32, %arg1: i32) -> (i32, i32) {
    %c1_i32 = arith.constant 1 : i32
    %0 = arith.muli %arg0, %c1_i32 : i32
    %1 = arith.addi %0, %arg1 : i32
    %c0_i32 = arith.constant 0 : i32
    %c0_i32_0 = arith.constant 0 : i32
    return %1, %c0_i32 : i32, i32
  }
  func.func @transform_2(%arg0: i32, %arg1: i32) -> (i32, i32) {
    %c0_i32 = arith.constant 0 : i32
    %c0_i32_0 = arith.constant 0 : i32
    return %arg0, %c0_i32 : i32, i32
  }
}

</mosaic_0001>

<bundles_post_ra>
// kernel: tpu_custom_call.1
= control target key start
LH: loop header
LB: loop body
LE: loop exit
PB: predicated region body
PF: predicated region fallthrough
CT: control target
= control target key end

     0   :  { %7 = vsyncpa [#allocation3], 0  ;;  %s241_s0 = inlined_call_operand.hbm [shape: f32[16,36], index: 0, kind: input, shape index: {}]   ;;  %s242_s1 = inlined_call_operand.hbm [shape: f32[16,36], index: 1, kind: input, shape index: {}]   ;;  %s243_s2 = inlined_call_operand.vmem [shape: f32[16,1], index: 2, kind: output, shape index: {}]  }
   0x1   :  { %8 = vsyncpa [#allocation5], 0  ;;  %s175_s9 = smov [#allocation2]   ;;  %s127_s13 = scalar_lea.hbm %s241_s0, 256 }
   0x2   :  { %s18_s10 = sshll.u32 %s175_s9, 4  ;;  %p128_p0 = scmp.ne.s32.totalorder %s241_s0, %s127_s13  ;;  %s19_s10 = int_to_ptr.vmem [resolvable:$true] %s18_s10 }
   0x3   :  { %p131_p1 = scmp.lt.u32.totalorder %s127_s13, %s241_s0 }
   0x5   :  { %p133_p2 = pnand %p131_p1, %p128_p0 }
   0x7   :  { %136 = shalt.err (!%p133_p2)
}
   0x8   :  { %s137_s18 = scalar_lea.vmem %s19_s10, 256  ;;  %p142_p4 = scmp.lt.s32.totalorder %s19_s10, %s19_s10 }
   0x9   :  { %p138_p3 = scmp.ne.s32.totalorder %s19_s10, %s137_s18  ;;  %p143_p5 = scmp.lt.s32.totalorder %s137_s18, %s137_s18 }
   0xb   :  { %p144_p6 = por %p143_p5, %p142_p4 }
   0xd   :  { %p145_p7 = pnand %p144_p6, %p138_p3 }
   0xf   :  { %148 = shalt.err (!%p145_p7)
}
  0x10   :  { %s176_s19 = smov 128   ;;  %s177_s20 = smov 8  }
  0x11   :  { %24 = dma.hbm_to_vmem [thread:$0]  %s241_s0, 256, %s19_s10, [#allocation3], %s176_s19, %s176_s19, %s177_s20  }
  0x12   :  { %s178_s23 = smov [#allocation4]   ;;  %s149_s27 = scalar_lea.hbm %s242_s1, 256 }
  0x13   :  { %s34_s24 = sshll.u32 %s178_s23, 4  ;;  %p150_p8 = scmp.ne.s32.totalorder %s242_s1, %s149_s27  ;;  %s35_s24 = int_to_ptr.vmem [resolvable:$true] %s34_s24 }
  0x14   :  { %p153_p9 = scmp.lt.u32.totalorder %s149_s27, %s242_s1 }
  0x16   :  { %p155_p10 = pnand %p153_p9, %p150_p8 }
  0x18   :  { %158 = shalt.err (!%p155_p10)
}
  0x19   :  { %s159_s4 = scalar_lea.vmem %s35_s24, 256  ;;  %p164_p12 = scmp.lt.s32.totalorder %s35_s24, %s35_s24 }
  0x1a   :  { %p160_p11 = scmp.ne.s32.totalorder %s35_s24, %s159_s4  ;;  %p165_p13 = scmp.lt.s32.totalorder %s159_s4, %s159_s4 }
  0x1c   :  { %p166_p0 = por %p165_p13, %p164_p12 }
  0x1e   :  { %p167_p1 = pnand %p166_p0, %p160_p11 }
  0x20   :  { %170 = shalt.err (!%p167_p1)
}
  0x21   :  { %40 = dma.hbm_to_vmem [thread:$0]  %s242_s1, 256, %s35_s24, [#allocation5], %s176_s19, %s176_s19, %s177_s20  }
  0x22   :  { %171 = dma.done.wait [#allocation3], 256  }
  0x23   :  { %172 = vsyncadd [#allocation3], 4294967040 }
  0x24   :  { %173 = dma.done.wait [#allocation5], 256  }
  0x25   :  { %174 = vsyncadd [#allocation5], 4294967040  ;;  %v58_v0 = vld [vmem:[#allocation2] sm:$0xff]  ;;  %v60_v1 = vld [vmem:[#allocation4] sm:$0xff]  ;;  %vm74_vm0 = vcmask 293888   ;;  %vm55_vm1 = vcmask 7168  }
  0x26   :  { %v59_v2 = vld [vmem:[#allocation2 + $0x8] sm:$0xff]  ;;  %v64_v3 = vmin.f32 %v58_v0, %v60_v1  ;;  %v61_v4 = vld [vmem:[#allocation4 + $0x8] sm:$0xff]  ;;  %v62_v5 = vmax.f32 %v58_v0, %v60_v1  ;;  %v179_v22 = vmov 0.0  }
  0x27   :  { %v65_v6 = vmin.f32 %v59_v2, %v61_v4  ;;  %v63_v7 = vmax.f32 %v59_v2, %v61_v4  ;;  %56 = vst.msk [vmem:[%s243_s2] sm:$0xff] %vm55_vm1, %v179_v22  ;;  %57 = vst.msk [vmem:[%s243_s2 + $0x8] sm:$0xff] %vm55_vm1, %v179_v22 }
  0x28   :  { %v70_v8 = vmax.f32 %v64_v3, 0.0  ;;  %v66_v9 = vmin.f32 %v64_v3, 0.0 }
  0x29   :  { %v71_v10 = vmax.f32 %v65_v6, 0.0  ;;  %v67_v11 = vmin.f32 %v65_v6, 0.0 }
  0x2a   :  { %v83_v12 = vmul.f32 %v70_v8, %v70_v8  ;;  %v68_v13 = vsub.f32 %v62_v5, %v66_v9 }
  0x2b   :  { %v84_v14 = vmul.f32 %v71_v10, %v71_v10  ;;  %v69_v15 = vsub.f32 %v63_v7, %v67_v11 }
  0x2c   :  { %v85_v16 = vsel %vm74_vm0, %v83_v12, 0.0  ;;  %v72_v17 = vmul.f32 %v68_v13, %v68_v13 }
  0x2d   :  { %86 = vadd.xlane.f32.xlu0 %v85_v16  ;;  %v73_v18 = vmul.f32 %v69_v15, %v69_v15  ;;  %v88_v19 = vsel %vm74_vm0, %v84_v14, 0.0 }
  0x2e   :  { %v75_v20 = vsel %vm74_vm0, %v72_v17, 0.0  ;;  %v93_v36 = vld [vmem:[%s243_s2] sm:$0xff]  ;;  %v94_v40 = vld [vmem:[%s243_s2 + $0x8] sm:$0xff] }
  0x2f   :  { %76 = vadd.xlane.f32.xlu1 %v75_v20  ;;  %v78_v21 = vsel %vm74_vm0, %v73_v18, 0.0 }
  0x31   :  { %89 = vadd.xlane.f32.xlu0 %v88_v19 }
  0x33   :  { %79 = vadd.xlane.f32.xlu1 %v78_v21 }
  0xba   :  { %v87_v23 = vpop.xlane.xlu0 %86 }
  0xbb   :  { %v91_v24 = vadd.f32 1e-06, %v87_v23 }
  0xbc   :  { %v77_v27 = vpop.xlane.xlu1 %76 }
  0xbd   :  { %119 = vrcp.f32 %v91_v24  ;;  %v81_v28 = vadd.f32 1e-06, %v77_v27 }
  0xbe   :  { %v90_v25 = vpop.xlane.xlu0 %89 }
  0xbf   :  { %v92_v26 = vadd.f32 1e-06, %v90_v25 }
  0xc0   :  { %v80_v29 = vpop.xlane.xlu1 %79 }
  0xc1   :  { %121 = vrcp.f32 %v92_v26  ;;  %v82_v32 = vadd.f32 1e-06, %v80_v29 }
  0xc7   :  { %v120_v30 = vpop.eup %119 }
  0xc8   :  { %v96_v31 = vmul.f32 %v120_v30, %v81_v28 }
  0xca   :  { %123 = vlog2.f32 %v96_v31 }
  0xcb   :  { %v122_v33 = vpop.eup %121 }
  0xcc   :  { %v98_v34 = vmul.f32 %v122_v33, %v82_v32 }
  0xce   :  { %125 = vlog2.f32 %v98_v34 }
  0xd4   :  { %v124_v35 = vpop.eup %123 }
  0xd5   :  { %v100_v37 = vmul.f32 0.6931472, %v124_v35 }
  0xd7   :  { %v103_v38 = vadd.f32 %v100_v37, %v93_v36 }
  0xd8   :  { %v126_v39 = vpop.eup %125 }
  0xd9   :  { %106 = vst.msk [vmem:[%s243_s2] sm:$0xff] %vm55_vm1, %v103_v38  ;;  %v102_v41 = vmul.f32 0.6931472, %v126_v39 }
  0xdb   :  { %v104_v42 = vadd.f32 %v102_v41, %v94_v40 }
  0xdd   :  { %107 = vst.msk [vmem:[%s243_s2 + $0x8] sm:$0xff] %vm55_vm1, %v104_v42 }
  0xde   :  { %112 = vsyncpa [#allocation3], 1 }
  0xdf   :  { %113 = vsyncpa [#allocation5], 1 }

</bundles_post_ra>
